<compile_context>
chip_gen: v6e
topology: v6e:2x2x1
jax: 0.10.0
libtpu: 0.0.40
codegen_flags: <defaults>
</compile_context>

<pallas_src>
import functools

import jax
import jax.numpy as jnp
from jax import lax
from jax.experimental import pallas as pl
from jax.experimental.pallas import tpu as pltpu


_MAX_POOL_CHUNKS = 64  # bound on the unrolled 128-lane chunk loop in pass 1


# ---------------------------------------------------------------------------
# Shared MLP + sigmoid (traced inside kernels; one-shot, tiny)
# ---------------------------------------------------------------------------
def _mlp_sigmoid(avg, mx, w1_ref, b1_ref, w2_ref, b2_ref):
    w1 = w1_ref[...].astype(jnp.float32)
    b1 = b1_ref[...].astype(jnp.float32)
    w2 = w2_ref[...].astype(jnp.float32)
    b2 = b2_ref[...].astype(jnp.float32)
    # Fuse both pooled vectors into a single first matmul.
    pooled = jnp.concatenate([avg, mx], axis=0)                    # (2B, C)
    h = jnp.maximum(
        jnp.dot(pooled, w1, preferred_element_type=jnp.float32) + b1, 0.0)
    B = avg.shape[0]
    h = h[:B] + h[B:]                                              # (B, H)
    # mlp(avg) + mlp(max) == (h_avg + h_max) @ W2 + 2*b2  (ReLU already applied)
    att = jnp.dot(h, w2, preferred_element_type=jnp.float32) + 2.0 * b2
    return jax.nn.sigmoid(att)                                     # (B, C) f32


# ---------------------------------------------------------------------------
# Fused single-pass fast path: whole x resident in VMEM
# ---------------------------------------------------------------------------
def _fused_kernel(x_ref, w1_ref, b1_ref, w2_ref, b2_ref, o_ref, *, L):
    x = x_ref[...].astype(jnp.float32)                             # (B, C, L)
    avg = jnp.sum(x, axis=2) * (1.0 / L)                           # (B, C)
    mx = jnp.max(x, axis=2)                                        # (B, C)
    scale = _mlp_sigmoid(avg, mx, w1_ref, b1_ref, w2_ref, b2_ref)  # (B, C)
    o_ref[...] = (x * scale[:, :, None]).astype(o_ref.dtype)


# ---------------------------------------------------------------------------
# Tiled pass 1: streamed sum/max pooling with lane-width accumulators
# ---------------------------------------------------------------------------
def _pool_kernel(x_ref, sum_ref, max_ref, sum_acc, max_acc, *, L, L_TILE):
    if L_TILE == L:
        # Single L tile per channel block: one-shot direct reduction
        # (the cross-lane reduce happens exactly once, so XLU cost is fixed).
        x = x_ref[...].astype(jnp.float32)
        sum_ref[...] = jnp.sum(x, axis=2)
        max_ref[...] = jnp.max(x, axis=2)
        return

    # Chunked path: L_TILE is a lane-dense multiple of 128 and L_TILE < L.
    lt = pl.program_id(1)
    n_lt = pl.num_programs(1)
    n_chunks = L_TILE // 128
    ragged = (L % L_TILE) != 0

    @pl.when(lt == 0)
    def _init():
        sum_acc[...] = jnp.zeros_like(sum_acc)
        max_acc[...] = jnp.full_like(max_acc, -jnp.inf)

    def accumulate(mask_tail):
        # Elementwise VALU adds/maxes on lane-width accumulators; the only
        # cross-lane (XLU) reduction is deferred to the final grid step.
        for k in range(n_chunks):
            chunk = x_ref[:, :, pl.ds(k * 128, 128)].astype(jnp.float32)
            if mask_tail:
                offs = (lt * L_TILE + k * 128
                        + lax.broadcasted_iota(jnp.int32, chunk.shape, 2))
                valid = offs < L
                sum_acc[...] += jnp.where(valid, chunk, 0.0)
                max_acc[...] = jnp.maximum(
                    max_acc[...], jnp.where(valid, chunk, -jnp.inf))
            else:
                sum_acc[...] += chunk
                max_acc[...] = jnp.maximum(max_acc[...], chunk)

    if ragged:
        # Only the last (ragged) tile pays the iota/compare/mask cost.
        @pl.when(lt < n_lt - 1)
        def _full_tiles():
            accumulate(False)

        @pl.when(lt == n_lt - 1)
        def _tail_tile():
            accumulate(True)
    else:
        accumulate(False)

    @pl.when(lt == n_lt - 1)
    def _finalize():
        sum_ref[...] = jnp.sum(sum_acc[...], axis=2)               # (B, c_tile)
        max_ref[...] = jnp.max(max_acc[...], axis=2)


# ---------------------------------------------------------------------------
# Tiny MLP + sigmoid kernel (one shot)
# ---------------------------------------------------------------------------
def _mlp_kernel(sum_ref, max_ref, w1_ref, b1_ref, w2_ref, b2_ref, scale_ref,
                *, L):
    avg = sum_ref[...] * (1.0 / L)
    scale_ref[...] = _mlp_sigmoid(avg, max_ref[...],
                                  w1_ref, b1_ref, w2_ref, b2_ref)


# ---------------------------------------------------------------------------
# Tiled pass 2: pure streaming broadcast-multiply
# ---------------------------------------------------------------------------
def _scale_mul_kernel(x_ref, scale_ref, o_ref):
    # For bf16 inputs the gate is rounded to bf16 before the product
    # (PyTorch-in-bf16 semantics); exact for f32 inputs.
    scale = scale_ref[...].astype(o_ref.dtype)                     # (B, C)
    o_ref[...] = x_ref[...] * scale[:, :, None]


# ---------------------------------------------------------------------------
# Tiling / VMEM-budget helpers
# ---------------------------------------------------------------------------
def _choose_c_tile(B, C, itemsize, target_block_bytes):
    """C tile for pass 1.  Must be a multiple of 128 (pooled outputs are
    lane-dense (B, c_tile) blocks) or the full C.  Splitting C lets both v7x
    TensorCores share the reduction and keeps the minimal 128-lane x block
    under the VMEM budget for large B*C."""
    if C % 128 != 0 or C < 256:
        return C
    cands = [c for c in range(C - 128, 127, -128) if C % c == 0]
    if not cands:
        return C
    fitting = [c for c in cands if B * c * 128 * itemsize <= target_block_bytes]
    return fitting[0] if fitting else cands[-1]


def _choose_l_tile(per_lane_bytes, L, target_block_bytes, max_lanes=None):
    """Largest lane-dense (multiple-of-128) L tile whose block stays under
    target_block_bytes (and max_lanes), or the full L when it already fits."""
    lanes = max(target_block_bytes // max(per_lane_bytes, 1), 128)
    if max_lanes is not None:
        lanes = min(lanes, max_lanes)
    if L <= 128 or L <= lanes:
        return L                      # full-dim block is always legal
    tile = max((lanes // 128) * 128, 128)
    return min(tile, (L // 128) * 128)


def _mosaic_params(block_bytes, dims):
    """CompilerParams with an explicit scoped-VMEM limit derived from the
    actual (double-buffered) blocks.  v5e's 16 MiB default scope is the
    binding default; all generations have >= 64 MiB physical VMEM, so a limit
    up to 48 MiB is safe everywhere."""
    # TODO(synk): for extreme B*C where even a single 128-lane block exceeds
    # ~48 MiB, tile over B as well.
    need = 2 * int(sum(block_bytes)) + (2 << 20)
    limit = int(min(max(need, 16 << 20), 48 << 20))
    return pltpu.CompilerParams(dimension_semantics=dims,
                                vmem_limit_bytes=limit)


# ---------------------------------------------------------------------------
# Public entry point
# ---------------------------------------------------------------------------
def channel_gate(x, w1, b1, w2, b2, *,
                 fused_vmem_bytes=4 << 20,     # single-pass path when x fits
                 pass1_block_bytes=6 << 20,    # only x is streamed in pass 1
                 pass2_block_bytes=3 << 20):   # x in + x out streamed in pass 2
    B, C, L = x.shape
    H = w1.shape[1]
    itemsize = jnp.dtype(x.dtype).itemsize
    x_bytes = B * C * L * itemsize

    # ---- fused single-pass fast path (2x|x| HBM traffic) -------------------
    if x_bytes <= fused_vmem_bytes:
        return pl.pallas_call(
            functools.partial(_fused_kernel, L=L),
            out_shape=jax.ShapeDtypeStruct((B, C, L), x.dtype),
            grid=(1,),
            in_specs=[
                pl.BlockSpec((B, C, L), lambda i: (0, 0, 0)),
                pl.BlockSpec((C, H), lambda i: (0, 0)),
                pl.BlockSpec((1, H), lambda i: (0, 0)),
                pl.BlockSpec((H, C), lambda i: (0, 0)),
                pl.BlockSpec((1, C), lambda i: (0, 0)),
            ],
            out_specs=pl.BlockSpec((B, C, L), lambda i: (0, 0, 0)),
            compiler_params=_mosaic_params([x_bytes, x_bytes], ("arbitrary",)),
        )(x, w1, b1, w2, b2)

    # ---- pass 1: streamed sum/max pooling ----------------------------------
    c_tile = _choose_c_tile(B, C, itemsize, pass1_block_bytes)
    l1 = _choose_l_tile(B * c_tile * itemsize, L, pass1_block_bytes,
                        max_lanes=_MAX_POOL_CHUNKS * 128)
    n_cb = C // c_tile
    n_l1 = pl.cdiv(L, l1)
    p1_block = B * c_tile * l1 * itemsize

    sums, maxs = pl.pallas_call(
        functools.partial(_pool_kernel, L=L, L_TILE=l1),
        out_shape=(jax.ShapeDtypeStruct((B, C), jnp.float32),
                   jax.ShapeDtypeStruct((B, C), jnp.float32)),
        grid=(n_cb, n_l1),
        in_specs=[pl.BlockSpec((B, c_tile, l1), lambda cb, lt: (0, cb, lt))],
        out_specs=(pl.BlockSpec((B, c_tile), lambda cb, lt: (0, cb)),
                   pl.BlockSpec((B, c_tile), lambda cb, lt: (0, cb))),
        scratch_shapes=[
            pltpu.VMEM((B, c_tile, 128), jnp.float32),   # lane-width running sum
            pltpu.VMEM((B, c_tile, 128), jnp.float32),   # lane-width running max
        ],
        compiler_params=_mosaic_params([p1_block], ("parallel", "arbitrary")),
    )(x)

    # ---- MLP + sigmoid -> gate scale (B, C) f32 -----------------------------
    scale = pl.pallas_call(
        functools.partial(_mlp_kernel, L=L),
        out_shape=jax.ShapeDtypeStruct((B, C), jnp.float32),
        grid=(1,),
        in_specs=[
            pl.BlockSpec((B, C), lambda i: (0, 0)),
            pl.BlockSpec((B, C), lambda i: (0, 0)),
            pl.BlockSpec((C, H), lambda i: (0, 0)),
            pl.BlockSpec((1, H), lambda i: (0, 0)),
            pl.BlockSpec((H, C), lambda i: (0, 0)),
            pl.BlockSpec((1, C), lambda i: (0, 0)),
        ],
        out_specs=pl.BlockSpec((B, C), lambda i: (0, 0)),
        compiler_params=pltpu.CompilerParams(
            dimension_semantics=("arbitrary",)),
    )(sums, maxs, w1, b1, w2, b2)

    # ---- pass 2: broadcast multiply over independent L tiles ----------------
    l2 = _choose_l_tile(B * C * itemsize, L, pass2_block_bytes)
    n_l2 = pl.cdiv(L, l2)
    p2_block = B * C * l2 * itemsize

    out = pl.pallas_call(
        _scale_mul_kernel,
        out_shape=jax.ShapeDtypeStruct((B, C, L), x.dtype),
        grid=(n_l2,),
        in_specs=[
            pl.BlockSpec((B, C, l2), lambda l: (0, 0, l)),
            pl.BlockSpec((B, C), lambda l: (0, 0)),
        ],
        out_specs=pl.BlockSpec((B, C, l2), lambda l: (0, 0, l)),
        compiler_params=_mosaic_params([p2_block, p2_block], ("parallel",)),
    )(x, scale)
    return out


# ---------------------------------------------------------------------------
# Pure-JAX reference
# ---------------------------------------------------------------------------
def channel_gate_ref(x, w1, b1, w2, b2):
    avg_pool = jnp.mean(x, axis=2)
    max_pool = jnp.max(x, axis=2)

    def mlp(p):
        h = jnp.maximum(p @ w1 + b1, 0.0)
        return h @ w2 + b2

    scale = jax.nn.sigmoid(mlp(avg_pool) + mlp(max_pool))
    return x * scale[:, :, None]


def _make_inputs(key, B, C, L, H):
    kx, k1, k2, k3, k4 = jax.random.split(key, 5)
    x = jax.random.normal(kx, (B, C, L), dtype=jnp.float32)
    # nn.Linear(C, H) / nn.Linear(H, C), stored pre-transposed: p @ W + b.
    w1 = jax.random.normal(k1, (C, H), dtype=jnp.float32) * 0.1
    b1 = jax.random.normal(k2, (1, H), dtype=jnp.float32) * 0.1
    w2 = jax.random.normal(k3, (H, C), dtype=jnp.float32) * 0.1
    b2 = jax.random.normal(k4, (1, C), dtype=jnp.float32) * 0.1
    return x, w1, b1, w2, b2


if __name__ == "__main__":
    key = jax.random.PRNGKey(0)
    ks = jax.random.split(key, 4)

    # --- case 1: module-consistent toy shapes (gate_channels=32, r=16) ------
    # small x -> fused single-pass fast path
    x, w1, b1, w2, b2 = _make_inputs(ks[0], 2, 32, 16, 2)
    out = channel_gate(x, w1, b1, w2, b2)
    jax.block_until_ready(out)
    ref = channel_gate_ref(x, w1, b1, w2, b2)
    assert jnp.allclose(out, ref, atol=1e-5, rtol=1e-5), "mismatch (fused case)"

    # --- case 2: tiled path, lane-dense 128 tiles + ragged last tile --------
    x, w1, b1, w2, b2 = _make_inputs(ks[1], 2, 32, 4000, 2)
    out = channel_gate(x, w1, b1, w2, b2, fused_vmem_bytes=0,
                       pass1_block_bytes=1 << 15, pass2_block_bytes=1 << 15)
    jax.block_until_ready(out)
    ref = channel_gate_ref(x, w1, b1, w2, b2)
    assert jnp.allclose(out, ref, atol=1e-4, rtol=1e-4), "mismatch (ragged case)"

    # --- case 3: tiled path with C-tiling + multi-chunk accumulation --------
    x, w1, b1, w2, b2 = _make_inputs(ks[2], 2, 256, 1024, 16)
    out = channel_gate(x, w1, b1, w2, b2, fused_vmem_bytes=0,
                       pass1_block_bytes=1 << 18, pass2_block_bytes=1 << 18)
    jax.block_until_ready(out)
    ref = channel_gate_ref(x, w1, b1, w2, b2)
    assert jnp.allclose(out, ref, atol=1e-4, rtol=1e-4), "mismatch (c-tiled case)"

    # --- case 4: tiled path, short L (< 128) -> direct-reduce branch --------
    x, w1, b1, w2, b2 = _make_inputs(ks[3], 4, 32, 100, 2)
    out = channel_gate(x, w1, b1, w2, b2, fused_vmem_bytes=0)
    jax.block_until_ready(out)
    ref = channel_gate_ref(x, w1, b1, w2, b2)
    assert jnp.allclose(out, ref, atol=1e-5, rtol=1e-5), "mismatch (short-L case)"

    print("KERNEL_OK")
</pallas_src>

<mosaic_0001>
module attributes {stable_mosaic.version = 11 : i64} {
  func.func @_fused_kernel(%arg0: i32, %arg1: memref<2x32x16xf32, #tpu.memory_space<vmem>>, %arg2: memref<32x2xf32, #tpu.memory_space<vmem>>, %arg3: memref<1x2xf32, #tpu.memory_space<vmem>>, %arg4: memref<2x32xf32, #tpu.memory_space<vmem>>, %arg5: memref<1x32xf32, #tpu.memory_space<vmem>>, %arg6: memref<2x32x16xf32, #tpu.memory_space<vmem>>) attributes {dimension_semantics = [#tpu.dimension_semantics<arbitrary>], iteration_bounds = array<i64: 1>, scalar_prefetch = 0 : i64, scratch_operands = 0 : i64, tpu.core_type = #tpu.core_type<tc>, window_params = [{pipeline_mode = #tpu.pipeline_mode<synchronous>, transform_indices = @transform_0, window_bounds = array<i64: 2, 32, 16>}, {pipeline_mode = #tpu.pipeline_mode<synchronous>, transform_indices = @transform_1, window_bounds = array<i64: 32, 2>}, {pipeline_mode = #tpu.pipeline_mode<synchronous>, transform_indices = @transform_2, window_bounds = array<i64: 1, 2>}, {pipeline_mode = #tpu.pipeline_mode<synchronous>, transform_indices = @transform_3, window_bounds = array<i64: 2, 32>}, {pipeline_mode = #tpu.pipeline_mode<synchronous>, transform_indices = @transform_4, window_bounds = array<i64: 1, 32>}, {pipeline_mode = #tpu.pipeline_mode<synchronous>, transform_indices = @transform_5, window_bounds = array<i64: 2, 32, 16>}]} {
    %c0 = arith.constant 0 : index
    %c0_0 = arith.constant 0 : index
    %c0_1 = arith.constant 0 : index
    %0 = vector.load %arg1[%c0, %c0_0, %c0_1] : memref<2x32x16xf32, #tpu.memory_space<vmem>>, vector<2x32x16xf32>
    %cst = arith.constant dense<0.000000e+00> : vector<2x32xf32>
    %1 = vector.multi_reduction <add>, %0, %cst [2] : vector<2x32x16xf32> to vector<2x32xf32>
    %cst_2 = arith.constant 6.250000e-02 : f32
    %2 = vector.broadcast %cst_2 : f32 to vector<2x32xf32>
    %3 = arith.mulf %1, %2 : vector<2x32xf32>
    %cst_3 = arith.constant dense<0xFF800000> : vector<2x32xf32>
    %4 = vector.multi_reduction <maximumf>, %0, %cst_3 [2] : vector<2x32x16xf32> to vector<2x32xf32>
    %c0_4 = arith.constant 0 : index
    %c0_5 = arith.constant 0 : index
    %5 = vector.load %arg2[%c0_4, %c0_5] : memref<32x2xf32, #tpu.memory_space<vmem>>, vector<32x2xf32>
    %c0_6 = arith.constant 0 : index
    %c0_7 = arith.constant 0 : index
    %6 = vector.load %arg3[%c0_6, %c0_7] : memref<1x2xf32, #tpu.memory_space<vmem>>, vector<1x2xf32>
    %c0_8 = arith.constant 0 : index
    %c0_9 = arith.constant 0 : index
    %7 = vector.load %arg4[%c0_8, %c0_9] : memref<2x32xf32, #tpu.memory_space<vmem>>, vector<2x32xf32>
    %c0_10 = arith.constant 0 : index
    %c0_11 = arith.constant 0 : index
    %8 = vector.load %arg5[%c0_10, %c0_11] : memref<1x32xf32, #tpu.memory_space<vmem>>, vector<1x32xf32>
    %9 = tpu.concatenate %3, %4 in 0 : vector<2x32xf32>, vector<2x32xf32> -> vector<4x32xf32>
    %cst_12 = arith.constant dense<0.000000e+00> : vector<4x2xf32>
    %10 = tpu.matmul %9, %5, %cst_12 {dimension_numbers = #tpu.dot_dimension_numbers<[1], [0], [0], [1], [0, 0, 1, 1], [], []>} : vector<4x32xf32>, vector<32x2xf32>, vector<4x2xf32> -> vector<4x2xf32>
    %11 = vector.broadcast %6 : vector<1x2xf32> to vector<4x2xf32>
    %12 = arith.addf %10, %11 : vector<4x2xf32>
    %cst_13 = arith.constant 0.000000e+00 : f32
    %13 = vector.broadcast %cst_13 : f32 to vector<4x2xf32>
    %14 = arith.maximumf %12, %13 : vector<4x2xf32>
    %15 = vector.extract_strided_slice %14 {offsets = [0, 0], sizes = [2, 2], strides = [1, 1]} : vector<4x2xf32> to vector<2x2xf32>
    %16 = vector.extract_strided_slice %14 {offsets = [2, 0], sizes = [2, 2], strides = [1, 1]} : vector<4x2xf32> to vector<2x2xf32>
    %17 = arith.addf %15, %16 : vector<2x2xf32>
    %cst_14 = arith.constant dense<0.000000e+00> : vector<2x32xf32>
    %18 = tpu.matmul %17, %7, %cst_14 {dimension_numbers = #tpu.dot_dimension_numbers<[1], [0], [0], [1], [0, 0, 1, 1], [], []>} : vector<2x2xf32>, vector<2x32xf32>, vector<2x32xf32> -> vector<2x32xf32>
    %cst_15 = arith.constant 2.000000e+00 : f32
    %19 = vector.broadcast %cst_15 : f32 to vector<1x32xf32>
    %20 = arith.mulf %19, %8 : vector<1x32xf32>
    %21 = vector.broadcast %20 : vector<1x32xf32> to vector<2x32xf32>
    %22 = arith.addf %18, %21 : vector<2x32xf32>
    %23 = arith.negf %22 : vector<2x32xf32>
    %24 = math.exp %23 : vector<2x32xf32>
    %cst_16 = arith.constant 1.000000e+00 : f32
    %25 = vector.broadcast %cst_16 : f32 to vector<2x32xf32>
    %26 = arith.addf %25, %24 : vector<2x32xf32>
    %27 = arith.divf %25, %26 : vector<2x32xf32>
    %28 = vector.shape_cast %27 : vector<2x32xf32> to vector<2x32x1xf32>
    %29 = vector.broadcast %28 : vector<2x32x1xf32> to vector<2x32x16xf32>
    %30 = arith.mulf %0, %29 : vector<2x32x16xf32>
    %c0_17 = arith.constant 0 : index
    %c0_18 = arith.constant 0 : index
    %c0_19 = arith.constant 0 : index
    %31 = vector.load %arg6[%c0_17, %c0_18, %c0_19] : memref<2x32x16xf32, #tpu.memory_space<vmem>>, vector<2x32x16xf32>
    tpu.vector_store %arg6[%c0_17, %c0_18, %c0_19], %30 {strides = array<i32>} : memref<2x32x16xf32, #tpu.memory_space<vmem>>, vector<2x32x16xf32>,
    return
  }
  func.func @transform_0(%arg0: i32) -> (i32, i32, i32) {
    %c0_i32 = arith.constant 0 : i32
    %c0_i32_0 = arith.constant 0 : i32
    %c0_i32_1 = arith.constant 0 : i32
    %c0_i32_2 = arith.constant 0 : i32
    return %c0_i32, %c0_i32_0, %c0_i32_1 : i32, i32, i32
  }
  func.func @transform_1(%arg0: i32) -> (i32, i32) {
    %c0_i32 = arith.constant 0 : i32
    %c0_i32_0 = arith.constant 0 : i32
    %c0_i32_1 = arith.constant 0 : i32
    return %c0_i32, %c0_i32_0 : i32, i32
  }
  func.func @transform_2(%arg0: i32) -> (i32, i32) {
    %c0_i32 = arith.constant 0 : i32
    %c0_i32_0 = arith.constant 0 : i32
    %c0_i32_1 = arith.constant 0 : i32
    return %c0_i32, %c0_i32_0 : i32, i32
  }
  func.func @transform_3(%arg0: i32) -> (i32, i32) {
    %c0_i32 = arith.constant 0 : i32
    %c0_i32_0 = arith.constant 0 : i32
    %c0_i32_1 = arith.constant 0 : i32
    return %c0_i32, %c0_i32_0 : i32, i32
  }
  func.func @transform_4(%arg0: i32) -> (i32, i32) {
    %c0_i32 = arith.constant 0 : i32
    %c0_i32_0 = arith.constant 0 : i32
    %c0_i32_1 = arith.constant 0 : i32
    return %c0_i32, %c0_i32_0 : i32, i32
  }
  func.func @transform_5(%arg0: i32) -> (i32, i32, i32) {
    %c0_i32 = arith.constant 0 : i32
    %c0_i32_0 = arith.constant 0 : i32
    %c0_i32_1 = arith.constant 0 : i32
    %c0_i32_2 = arith.constant 0 : i32
    return %c0_i32, %c0_i32_0, %c0_i32_1 : i32, i32, i32
  }
}

</mosaic_0001>

<bundles_post_ra>
// kernel: tpu_custom_call.1
= control target key start
LH: loop header
LB: loop body
LE: loop exit
PB: predicated region body
PF: predicated region fallthrough
CT: control target
= control target key end

     0   :  { %vm28_vm0 = vcmask 130048   ;;  %v467_v24 = vmov 0.0   ;;  %vm468_vm1 = vmmov 0   ;;  %v100_v33 = vlaneseq  ;;  %s652_s0 = inlined_call_operand.vmem [shape: f32[2,32,16], index: 0, kind: input, shape index: {}]   ;;  %s653_s1 = inlined_call_operand.vmem [shape: f32[32,2], index: 1, kind: input, shape index: {}]   ;;  %s654_s3 = inlined_call_operand.vmem [shape: f32[2,32], index: 3, kind: input, shape index: {}]   ;;  %s655_s2 = inlined_call_operand.vmem [shape: f32[1,2], index: 2, kind: input, shape index: {}]   ;;  %s656_s4 = inlined_call_operand.vmem [shape: f32[1,32], index: 4, kind: input, shape index: {}]   ;;  %s657_s5 = inlined_call_operand.vmem [shape: f32[2,32,16], index: 5, kind: output, shape index: {}]  }
   0x1   :  { %v502_v0 = vld [vmem:[%s652_s0 + $0x20] sm:$0xff]  ;;  %v512_v2 = vld [vmem:[%s652_s0 + $0x28] sm:$0xff]  ;;  %v530_v8 = vld [vmem:[%s652_s0 + $0x30] sm:$0xff]  ;;  %445 = vmatprep.subr.mxu0 %v467_v24  ;;  %456 = vmatprep.subr.mxu1 %v467_v24  ;;  %vm111_vm2 = vcmask 130112   ;;  %vm118_vm3 = vcmask 195712   ;;  %vm125_vm4 = vcmask 261312  }
   0x2   :  { %v507_v1 = vld [vmem:[%s652_s0] sm:$0xff]  ;;  %v41_v3 = vsel %vm28_vm0, %v502_v0, 0.0  ;;  %v521_v5 = vld [vmem:[%s652_s0 + $0x8] sm:$0xff]  ;;  %v44_v6 = vsel %vm28_vm0, %v512_v2, 0.0  ;;  %v535_v9 = vld [vmem:[%s652_s0 + $0x10] sm:$0xff]  ;;  %v47_v10 = vsel %vm28_vm0, %v530_v8, 0.0  ;;  %453 = vmatprep.mubr.msk.f32.mxu0 %vm468_vm1, %v467_v24  ;;  %458 = vmatprep.mubr.msk.f32.mxu1 %vm468_vm1, %v467_v24 }
   0x3   :  { %v29_v4 = vsel %vm28_vm0, %v507_v1, 0.0  ;;  %42 = vadd.xlane.f32.xlu1 %v41_v3  ;;  %v32_v7 = vsel %vm28_vm0, %v521_v5, 0.0  ;;  %v35_v11 = vsel %vm28_vm0, %v535_v9, 0.0  ;;  %v544_v12 = vld [vmem:[%s652_s0 + $0x38] sm:$0xff]  ;;  %v64_v16 = vsel %vm28_vm0, %v521_v5, -inf  ;;  %v87_v26 = vld [vmem:[%s653_s1 + $0x10] sm:$0xff] }
   0x4   :  { %30 = vadd.xlane.f32.xlu0 %v29_v4  ;;  %v549_v13 = vld [vmem:[%s652_s0 + $0x18] sm:$0xff]  ;;  %v50_v14 = vsel %vm28_vm0, %v544_v12, 0.0  ;;  %v61_v17 = vsel %vm28_vm0, %v507_v1, -inf  ;;  %v76_v18 = vsel %vm28_vm0, %v512_v2, -inf  ;;  %v73_v19 = vsel %vm28_vm0, %v502_v0, -inf  ;;  %v86_v27 = vld [vmem:[%s653_s1 + $0x8] sm:$0xff] }
   0x5   :  { %v38_v15 = vsel %vm28_vm0, %v549_v13, 0.0  ;;  %v79_v20 = vsel %vm28_vm0, %v530_v8, -inf  ;;  %v67_v21 = vsel %vm28_vm0, %v535_v9, -inf  ;;  %v82_v22 = vsel %vm28_vm0, %v544_v12, -inf  ;;  %v88_v25 = vld [vmem:[%s653_s1 + $0x18] sm:$0xff]  ;;  %v85_v28 = vld [vmem:[%s653_s1] sm:$0xff] }
   0x6   :  { %v70_v23 = vsel %vm28_vm0, %v549_v13, -inf  ;;  %446 = vmatpush3.msra.mxu0 %v88_v25  ;;  %v101_v36 = vand.u32 127, %v100_v33  ;;  %v583_v39 = vshrl.u32 %v100_v33, 7  ;;  %vm146_vm5 = vcmask 1041409  }
   0x7   :  { %45 = vadd.xlane.f32.xlu1 %v44_v6  ;;  %447 = vmatprep.subr.mxu0 %v467_v24  ;;  %vm195_vm6 = vcmask 1043459   ;;  %vm198_vm7 = vcmask 1041408   ;;  %vm206_vm8 = vcmask 261120   ;;  %vm292_vm9 = vcmask 15360  }
   0x8   :  { %33 = vadd.xlane.f32.xlu0 %v32_v7  ;;  %448 = vmatpush3.msra.mxu0 %v87_v26  ;;  %v106_v40 = vadd.s32 4294967288, %v101_v36  ;;  %v113_v41 = vadd.s32 4294967280, %v101_v36  ;;  %v120_v42 = vadd.s32 4294967272, %v101_v36  ;;  %v104_v45 = vsub.s32 %v101_v36, %v583_v39 }
   0x9   :  { %449 = vmatprep.subr.mxu0 %v467_v24 }
   0xa   :  { %450 = vmatpush3.msra.mxu0 %v86_v27  ;;  %v109_v46 = vsub.s32 %v106_v40, %v583_v39  ;;  %v116_v49 = vsub.s32 %v113_v41, %v583_v39  ;;  %v123_v52 = vsub.s32 %v120_v42, %v583_v39  ;;  %v433_v40 = vld [vmem:[%s655_s2] ss:$0 sm:$0xff] }
   0xb   :  { %48 = vadd.xlane.f32.xlu1 %v47_v10  ;;  %451 = vmatprep.subr.mxu0 %v467_v24 }
   0xc   :  { %36 = vadd.xlane.f32.xlu0 %v35_v11  ;;  %452 = vmatpush3.msra.mxu0 %v85_v28 }
   0xf   :  { %51 = vadd.xlane.f32.xlu1 %v50_v14 }
  0x10   :  { %39 = vadd.xlane.f32.xlu0 %v38_v15 }
  0x13   :  { %65 = vmax.xlane.f32.xlu1 %v64_v16 }
  0x14   :  { %62 = vmax.xlane.f32.xlu0 %v61_v17 }
  0x17   :  { %77 = vmax.xlane.f32.xlu1 %v76_v18 }
  0x18   :  { %74 = vmax.xlane.f32.xlu0 %v73_v19 }
  0x1b   :  { %80 = vmax.xlane.f32.xlu1 %v79_v20 }
  0x1c   :  { %68 = vmax.xlane.f32.xlu0 %v67_v21 }
  0x1f   :  { %83 = vmax.xlane.f32.xlu1 %v82_v22 }
  0x20   :  { %71 = vmax.xlane.f32.xlu0 %v70_v23 }
  0x8c   :  { %v43_v29 = vpop.xlane.xlu1 %42 }
  0x8d   :  { %v31_v30 = vpop.xlane.xlu0 %30  ;;  %v57_v53 = vmul.f32 0.0625, %v43_v29 }
  0x8e   :  { %v53_v54 = vmul.f32 0.0625, %v31_v30 }
  0x8f   :  { %v130_v63 = vrot.slane %v57_v53, %v104_v45 }
  0x90   :  { %v46_v31 = vpop.xlane.xlu1 %45  ;;  %v105_v3 = vrot.slane %v53_v54, %v104_v45 }
  0x91   :  { %v34_v32 = vpop.xlane.xlu0 %33  ;;  %v58_v47 = vmul.f32 0.0625, %v46_v31 }
  0x92   :  { %v54_v48 = vmul.f32 0.0625, %v34_v32 }
  0x93   :  { %v134_v59 = vrot.slane %v58_v47, %v109_v46  ;;  %v91_v47 = vld [vmem:[%s656_s4] sm:$0x1] }
  0x94   :  { %v49_v34 = vpop.xlane.xlu1 %48  ;;  %v110_v60 = vrot.slane %v54_v48, %v109_v46  ;;  %v285_v48 = vmul.f32 2.0, %v91_v47 }
  0x95   :  { %v37_v35 = vpop.xlane.xlu0 %36  ;;  %v59_v50 = vmul.f32 0.0625, %v49_v34  ;;  %v135_v17 = vsel %vm111_vm2, %v134_v59, %v130_v63  ;;  %v396_v59 = vsub.s32 1, %v583_v39 }
  0x96   :  { %v55_v51 = vmul.f32 0.0625, %v37_v35  ;;  %v112_v18 = vsel %vm111_vm2, %v110_v60, %v105_v3 }
  0x97   :  { %v139_v61 = vrot.slane %v59_v50, %v116_v49 }
  0x98   :  { %v52_v37 = vpop.xlane.xlu1 %51  ;;  %v117_v62 = vrot.slane %v55_v51, %v116_v49 }
  0x99   :  { %v40_v38 = vpop.xlane.xlu0 %39  ;;  %v60_v55 = vmul.f32 0.0625, %v52_v37  ;;  %v140_v21 = vsel %vm118_vm3, %v139_v61, %v135_v17 }
  0x9a   :  { %v56_v56 = vmul.f32 0.0625, %v40_v38  ;;  %v119_v22 = vsel %vm118_vm3, %v117_v62, %v112_v18  ;;  %v90_v38 = vld [vmem:[%s654_s3] sm:$0x3] }
  0x9b   :  { %v144_v4 = vrot.slane %v60_v55, %v123_v52  ;;  %457 = vmatpush3.msk.msra.mxu1 %vm198_vm7, %v90_v38 }
  0x9c   :  { %v66_v43 = vpop.xlane.xlu1 %65  ;;  %v124_v6 = vrot.slane %v56_v56, %v123_v52 }
  0x9d   :  { %v63_v44 = vpop.xlane.xlu0 %62  ;;  %v164_v11 = vrot.slane %v66_v43, %v109_v46  ;;  %v145_v23 = vsel %vm125_vm4, %v144_v4, %v140_v21 }
  0x9e   :  { %v160_v14 = vrot.slane %v63_v44, %v104_v45  ;;  %v126_v24 = vsel %vm125_vm4, %v124_v6, %v119_v22 }
  0x9f   :  { %v147_v35 = vsel %vm146_vm5, %v145_v23, %v126_v24 }
  0xa0   :  { %v78_v57 = vpop.xlane.xlu1 %77  ;;  %v165_v27 = vsel %vm111_vm2, %v164_v11, %v160_v14 }
  0xa1   :  { %v75_v58 = vpop.xlane.xlu0 %74  ;;  %v183_v15 = vrot.slane %v78_v57, %v109_v46 }
  0xa2   :  { %v179_v16 = vrot.slane %v75_v58, %v104_v45 }
  0xa4   :  { %v81_v7 = vpop.xlane.xlu1 %80  ;;  %v184_v28 = vsel %vm111_vm2, %v183_v15, %v179_v16 }
  0xa5   :  { %v69_v10 = vpop.xlane.xlu0 %68  ;;  %v188_v19 = vrot.slane %v81_v7, %v116_v49 }
  0xa6   :  { %v169_v20 = vrot.slane %v69_v10, %v116_v49  ;;  %v289_v49 = vsub.s32 0, %v583_v39 }
  0xa7   :  { %v189_v31 = vsel %vm118_vm3, %v188_v19, %v184_v28 }
  0xa8   :  { %v84_v25 = vpop.xlane.xlu1 %83  ;;  %v170_v32 = vsel %vm118_vm3, %v169_v20, %v165_v27  ;;  %v290_v50 = vrot.slane %v285_v48, %v289_v49 }
  0xa9   :  { %v72_v26 = vpop.xlane.xlu0 %71  ;;  %v193_v29 = vrot.slane %v84_v25, %v123_v52 }
  0xaa   :  { %v174_v30 = vrot.slane %v72_v26, %v123_v52 }
  0xab   :  { %v194_v33 = vsel %vm125_vm4, %v193_v29, %v189_v31 }
  0xac   :  { %v175_v34 = vsel %vm125_vm4, %v174_v30, %v170_v32 }
  0xad   :  { %v196_v36 = vsel %vm195_vm6, %v194_v33, %v175_v34 }
  0xae   :  { %v199_v37 = vsel %vm198_vm7, %v147_v35, %v196_v36 }
  0xaf   :  { %454 = vmatmul.mubr.msk.f32.vlgmr.msra.gmra.mxu0 %vm206_vm8, %v199_v37 }
 0x16f   :  { %v276_v41 = vpop.f32.mrf.mxu0 }
 0x170   :  { %v277_v42 = vadd.f32 %v433_v40, %v276_v41 }
 0x171   :  { %v455_v43 = vpop.f32.mrf.mxu0 }
 0x172   :  { %v280_v44 = vmax.f32 %v277_v42, 0.0 }
 0x174   :  { %v282_v45 = vrot.slane %v280_v44, 2 }
 0x176   :  { %v284_v46 = vadd.f32 %v282_v45, %v280_v44 }
 0x178   :  { %459 = vmatmul.mubr.msk.f32.vlgmr.msra.gmra.mxu1 %vm292_vm9, %v284_v46 }
 0x238   :  { %v365_v51 = vpop.f32.mrf.mxu1 }
 0x239   :  { %v366_v52 = vadd.f32 %v365_v51, %v290_v50 }
 0x23a   :  { %v460_v53 = vpop.f32.mrf.mxu1 }
 0x23b   :  { %v437_v54 = vmul.f32 -1.442695, %v366_v52 }
 0x23d   :  { %463 = vpow2.f32 %v437_v54 }
 0x24a   :  { %v464_v55 = vpop.eup %463 }
 0x24b   :  { %v372_v56 = vadd.f32 1.0, %v464_v55 }
 0x24d   :  { %465 = vrcp.f32 %v372_v56 }
 0x25a   :  { %v466_v57 = vpop.eup %465 }
 0x25b   :  { %v378_v58 = vrot.slane %v466_v57, %v289_v49  ;;  %v397_v60 = vrot.slane %v466_v57, %v396_v59 }
 0x25d   :  { %384 = vbcast.lane.b32.xlu1 %v378_v58, 264  ;;  %380 = vbcast.lane.b32.xlu0 %v378_v58, 256 }
 0x261   :  { %388 = vbcast.lane.b32.xlu1 %v378_v58, 272  ;;  %399 = vbcast.lane.b32.xlu0 %v397_v60, 256 }
 0x265   :  { %392 = vbcast.lane.b32.xlu1 %v378_v58, 280  ;;  %407 = vbcast.lane.b32.xlu0 %v397_v60, 272 }
 0x269   :  { %403 = vbcast.lane.b32.xlu1 %v397_v60, 264 }
 0x26d   :  { %411 = vbcast.lane.b32.xlu1 %v397_v60, 280 }
 0x2cf   :  { %v385_v61 = vpop.permute.xlu1 %384  ;;  %v381_v62 = vpop.permute.xlu0 %380 }
 0x2d0   :  { %v414_v63 = vmul.f32 %v385_v61, %v521_v5  ;;  %v413_v3 = vmul.f32 %v381_v62, %v507_v1 }
 0x2d2   :  { %422 = vst.msk [vmem:[%s657_s5 + $0x8] sm:$0xff] %vm28_vm0, %v414_v63  ;;  %421 = vst.msk [vmem:[%s657_s5] sm:$0xff] %vm28_vm0, %v413_v3 }
 0x2d3   :  { %v389_v39 = vpop.permute.xlu1 %388  ;;  %v400_v4 = vpop.permute.xlu0 %399 }
 0x2d4   :  { %v415_v6 = vmul.f32 %v389_v39, %v535_v9  ;;  %v417_v7 = vmul.f32 %v400_v4, %v502_v0 }
 0x2d6   :  { %423 = vst.msk [vmem:[%s657_s5 + $0x10] sm:$0xff] %vm28_vm0, %v415_v6  ;;  %425 = vst.msk [vmem:[%s657_s5 + $0x20] sm:$0xff] %vm28_vm0, %v417_v7 }
 0x2d7   :  { %v393_v1 = vpop.permute.xlu1 %392  ;;  %v408_v5 = vpop.permute.xlu0 %407 }
 0x2d8   :  { %v416_v10 = vmul.f32 %v393_v1, %v549_v13  ;;  %v419_v11 = vmul.f32 %v408_v5, %v530_v8 }
 0x2da   :  { %424 = vst.msk [vmem:[%s657_s5 + $0x18] sm:$0xff] %vm28_vm0, %v416_v10  ;;  %427 = vst.msk [vmem:[%s657_s5 + $0x30] sm:$0xff] %vm28_vm0, %v419_v11 }
 0x2db   :  { %v404_v0 = vpop.permute.xlu1 %403 }
 0x2dc   :  { %v418_v9 = vmul.f32 %v404_v0, %v512_v2 }
 0x2de   :  { %426 = vst.msk [vmem:[%s657_s5 + $0x28] sm:$0xff] %vm28_vm0, %v418_v9 }
 0x2df   :  { %v412_v13 = vpop.permute.xlu1 %411 }
 0x2e0   :  { %v420_v8 = vmul.f32 %v412_v13, %v544_v12 }
 0x2e2   :  { %428 = vst.msk [vmem:[%s657_s5 + $0x38] sm:$0xff] %vm28_vm0, %v420_v8 }

</bundles_post_ra>
